<compile_context>
chip_gen: v5e
topology: v5e:2x2
jax: 0.10.0
libtpu: 0.0.40
codegen_flags: <defaults>
</compile_context>

<pallas_src>
import functools
import math

import jax
import jax.numpy as jnp
from jax import lax
from jax.experimental import pallas as pl
from jax.experimental.pallas import tpu as pltpu


_NEG_INF_BIAS = -1000000000.0


# ------------------------------ helpers ------------------------------------ #

def _pick_tile(dim, candidates):
    """Largest candidate that divides `dim`, else the full dim.

    NOTE: falls back to the full dimension when nothing divides; callers keep
    that case small enough for VMEM (true for the shapes exercised here).
    """
    for c in candidates:
        if dim % c == 0:
            return c
    return dim


@functools.lru_cache(maxsize=1)
def _vmem_limit_bytes():
    """~85% of per-core VMEM (v5e/v6e ~109 MiB, v7x ~54 MiB); 64 MiB fallback."""
    limit = 64 * 1024 * 1024
    try:
        cap = int(pltpu.get_tpu_info().vmem_capacity_bytes)
        limit = max(32 * 1024 * 1024, min(int(cap * 0.85), 112 * 1024 * 1024))
    except Exception:
        pass
    return limit


# -------------------------- tiled linear (MXU) ------------------------------ #

def _matmul_bias_kernel(x_ref, w_ref, b_ref, o_ref, acc_ref):
    # x: (tm, tk), w: (tk, tn), b: (1, tn) f32, acc: (tm, tn) f32
    @pl.when(pl.program_id(2) == 0)
    def _init():
        acc_ref[...] = jnp.zeros(acc_ref.shape, acc_ref.dtype)

    acc_ref[...] += jnp.dot(x_ref[...], w_ref[...],
                            preferred_element_type=jnp.float32)

    @pl.when(pl.program_id(2) == pl.num_programs(2) - 1)
    def _finalize():
        o_ref[...] = (acc_ref[...] + b_ref[...]).astype(o_ref.dtype)


def linear(x2d, w_t, bias, out_dtype):
    """y = x2d @ w_t + bias.  `w_t` is pre-transposed to (d_in, d_out)."""
    M, K = x2d.shape
    K2, N = w_t.shape
    assert K == K2
    x2d = x2d.astype(w_t.dtype)                 # compute dtype (f32 or bf16)
    b2d = bias.reshape(1, N).astype(jnp.float32)

    # Memory-bound weight streaming: large tiles cut the ~0.35us/step overhead
    # and lift the HBM roofline fraction (512-wide >> 256-wide on v5e/v6e).
    tm = _pick_tile(M, (512, 256, 128))
    tn = _pick_tile(N, (512, 256, 128))
    tk = _pick_tile(K, (1024, 512, 256, 128))

    cost = pl.CostEstimate(
        flops=2 * M * N * K,
        transcendentals=0,
        bytes_accessed=(M * K + K * N + M * N) * x2d.dtype.itemsize + 4 * N,
    )

    return pl.pallas_call(
        _matmul_bias_kernel,
        out_shape=jax.ShapeDtypeStruct((M, N), out_dtype),
        grid=(M // tm, N // tn, K // tk),
        in_specs=[
            pl.BlockSpec((tm, tk), lambda i, j, kk: (i, kk)),
            pl.BlockSpec((tk, tn), lambda i, j, kk: (kk, j)),
            pl.BlockSpec((1, tn), lambda i, j, kk: (0, j)),
        ],
        out_specs=pl.BlockSpec((tm, tn), lambda i, j, kk: (i, j)),
        scratch_shapes=[pltpu.VMEM((tm, tn), jnp.float32)],
        compiler_params=pltpu.CompilerParams(
            dimension_semantics=("parallel", "parallel", "arbitrary"),
            vmem_limit_bytes=_vmem_limit_bytes(),
        ),
        cost_estimate=cost,
    )(x2d, w_t, b2d)


# --------------------- flash-style multi-head attention --------------------- #

def _online_softmax_step(qh, kh, vh, bias, m_prev, l_prev, acc_prev, mxu_dtype):
    """One flash KV-tile update for a single head (f32 softmax / accumulation).

    Scores are NOT rescaled here: 1/sqrt(d_k) is folded into the Q weights.
    """
    # Q @ K^T without an explicit transpose: contract the last dims.
    s = lax.dot_general(qh.astype(mxu_dtype), kh.astype(mxu_dtype),
                        (((1,), (1,)), ((), ())),
                        preferred_element_type=jnp.float32)        # (tq, tkv)
    if bias is not None:
        s = s + bias                                               # hoisted mask
    m_new = jnp.maximum(m_prev, jnp.max(s, axis=-1, keepdims=True))
    alpha = jnp.exp(m_prev - m_new)                                # (tq, 1)
    p = jnp.exp(s - m_new)                                         # (tq, tkv)
    l_new = alpha * l_prev + jnp.sum(p, axis=-1, keepdims=True)
    # NOTE: PV has MXU N = d_k (<=128 for many configs): keep tkv deep to
    # amortize the underutilized 256-wide MXU on v6e/v7x.
    pv = lax.dot_general(p.astype(mxu_dtype), vh.astype(mxu_dtype),
                         (((1,), (0,)), ((), ())),
                         preferred_element_type=jnp.float32)       # (tq, d_k)
    acc_new = alpha * acc_prev + pv
    return m_new, l_new, acc_new


def _mask_bias(mask_ref):
    # Additive bias built ONCE per grid step (outside the per-head work).
    # int8 -> int32 widen kept for lowering robustness.
    mk = mask_ref[0].astype(jnp.int32)         # (1, tkv) key mask / (tq, tkv)
    return jnp.where(mk == 0, _NEG_INF_BIAS, 0.0).astype(jnp.float32)


def _make_attn_kernel_grid_heads(use_mask, use_approx, mxu_dtype):
    """One (batch, head, q-tile) per grid step; kv tiles on the innermost axis."""

    def kernel(*refs):
        if use_mask:
            q_ref, k_ref, v_ref, mask_ref, o_ref, m_sc, l_sc, acc_sc = refs
        else:
            q_ref, k_ref, v_ref, o_ref, m_sc, l_sc, acc_sc = refs
        kv = pl.program_id(3)

        @pl.when(kv == 0)
        def _init():
            m_sc[...] = jnp.full(m_sc.shape, -jnp.inf, m_sc.dtype)
            l_sc[...] = jnp.zeros(l_sc.shape, l_sc.dtype)
            acc_sc[...] = jnp.zeros(acc_sc.shape, acc_sc.dtype)

        bias = _mask_bias(mask_ref) if use_mask else None
        m_new, l_new, acc_new = _online_softmax_step(
            q_ref[0], k_ref[0], v_ref[0], bias,
            m_sc[...], l_sc[...], acc_sc[...], mxu_dtype)
        m_sc[...] = m_new
        l_sc[...] = l_new
        acc_sc[...] = acc_new

        @pl.when(kv == pl.num_programs(3) - 1)
        def _finalize():
            inv = pl.reciprocal(l_sc[...], approx=use_approx)      # (tq, 1)
            o_ref[0] = (acc_sc[...] * inv).astype(o_ref.dtype)     # lane-dense

    return kernel


def _make_attn_kernel_head_loop(heads, d_k, use_mask, use_approx, mxu_dtype):
    """Lane-dense (B, S, d_model) blocks; in-kernel head loop (unaligned d_k).

    Per-head running state is (heads, tq, *) scratch so each hot-loop update is
    a full-tile leading-axis store; the epilogue writes one dense output tile.
    The loop is statically unrolled (dynamic lane-dim slicing of widths that
    are not 128-aligned is not reliably lowerable); aligned d_k uses the grid.
    """

    def kernel(*refs):
        if use_mask:
            q_ref, k_ref, v_ref, mask_ref, o_ref, m_sc, l_sc, acc_sc = refs
        else:
            q_ref, k_ref, v_ref, o_ref, m_sc, l_sc, acc_sc = refs
        kv = pl.program_id(2)

        @pl.when(kv == 0)
        def _init():
            m_sc[...] = jnp.full(m_sc.shape, -jnp.inf, m_sc.dtype)
            l_sc[...] = jnp.zeros(l_sc.shape, l_sc.dtype)
            acc_sc[...] = jnp.zeros(acc_sc.shape, acc_sc.dtype)

        bias = _mask_bias(mask_ref) if use_mask else None

        for h in range(heads):                       # static lane offsets
            col = pl.ds(h * d_k, d_k)
            m_new, l_new, acc_new = _online_softmax_step(
                q_ref[0, :, col], k_ref[0, :, col], v_ref[0, :, col], bias,
                m_sc[h], l_sc[h], acc_sc[h], mxu_dtype)
            m_sc[h] = m_new
            l_sc[h] = l_new
            acc_sc[h] = acc_new

        @pl.when(kv == pl.num_programs(2) - 1)
        def _finalize():
            parts = []
            for h in range(heads):
                inv = pl.reciprocal(l_sc[h], approx=use_approx)    # (tq, 1)
                parts.append(acc_sc[h] * inv)                      # (tq, d_k)
            # Single lane-dense (tq, d_model) store.
            o_ref[0] = jnp.concatenate(parts, axis=-1).astype(o_ref.dtype)

    return kernel


def _attn_tiles(Sq, Sk, lane_width, itemsize, budget_bytes):
    """Pick (tq, tkv) and shrink until the per-step VMEM footprint fits."""
    tq = _pick_tile(Sq, (512, 256, 128))
    tkv = _pick_tile(Sk, (1024, 512, 256, 128))

    def footprint(tq_, tkv_):
        blocks = 2 * (2 * tq_ + 2 * tkv_) * lane_width * itemsize   # dbl-buffered
        scratch = (lane_width + 2) * tq_ * 4                        # f32 acc/m/l
        temps = 2 * tq_ * tkv_ * 4                                  # s and p
        return blocks + scratch + temps

    while tkv >= 256 and Sk % (tkv // 2) == 0 and footprint(tq, tkv) > budget_bytes:
        tkv //= 2
    while tq >= 256 and Sq % (tq // 2) == 0 and footprint(tq, tkv) > budget_bytes:
        tq //= 2
    return tq, tkv


def attention_heads(qp, kp, vp, heads, mask=None, mxu_dtype=None):
    """qp: (B, Sq, d_model); kp/vp: (B, Sk, d_model).  Output (B, Sq, d_model)."""
    B, Sq, d_model = qp.shape
    Sk = kp.shape[1]
    d_k = d_model // heads
    if mxu_dtype is None:
        mxu_dtype = qp.dtype
    use_approx = (qp.dtype == jnp.bfloat16) or (mxu_dtype == jnp.bfloat16)

    head_on_grid = (heads == 1) or (d_k % 128 == 0)
    lane_width = d_k if head_on_grid else d_model
    vmem_limit = _vmem_limit_bytes()
    tq, tkv = _attn_tiles(Sq, Sk, lane_width, qp.dtype.itemsize,
                          budget_bytes=vmem_limit // 2)

    # ---- mask normalisation: never materialise a broadcast along Sq -------- #
    use_mask = mask is not None
    mask_is_key = False
    mask_arr = None
    if use_mask:
        m = jnp.asarray(mask)
        if m.ndim == 2:                          # (B, Sk) key-padding mask
            m = m[:, None, :]
        if m.ndim == 3 and m.shape[1] == 1:      # (B, 1, Sk): broadcast over Sq
            mask_is_key = True
            mask_arr = jnp.broadcast_to(m, (B, 1, Sk)).astype(jnp.int8)
        else:                                    # full (B, Sq, Sk) mask
            mask_arr = jnp.broadcast_to(m, (B, Sq, Sk)).astype(jnp.int8)

    itemsize = qp.dtype.itemsize
    mask_bytes = int(mask_arr.size) if use_mask else 0
    cost = pl.CostEstimate(
        flops=4 * B * Sq * Sk * d_model,
        transcendentals=B * heads * Sq * Sk,
        bytes_accessed=(2 * B * Sq * d_model + 2 * B * Sk * d_model) * itemsize
        + mask_bytes,
    )

    if head_on_grid:
        kern = _make_attn_kernel_grid_heads(use_mask, use_approx, mxu_dtype)
        grid = (B, heads, Sq // tq, Sk // tkv)
        in_specs = [
            pl.BlockSpec((1, tq, d_k), lambda b, h, qi, ki: (b, qi, h)),
            pl.BlockSpec((1, tkv, d_k), lambda b, h, qi, ki: (b, ki, h)),
            pl.BlockSpec((1, tkv, d_k), lambda b, h, qi, ki: (b, ki, h)),
        ]
        if use_mask:
            if mask_is_key:
                in_specs.append(
                    pl.BlockSpec((1, 1, tkv), lambda b, h, qi, ki: (b, 0, ki)))
            else:
                in_specs.append(
                    pl.BlockSpec((1, tq, tkv), lambda b, h, qi, ki: (b, qi, ki)))
        out_spec = pl.BlockSpec((1, tq, d_k), lambda b, h, qi, ki: (b, qi, h))
        scratch = [pltpu.VMEM((tq, 1), jnp.float32),      # running max m
                   pltpu.VMEM((tq, 1), jnp.float32),      # running sum l
                   pltpu.VMEM((tq, d_k), jnp.float32)]    # running acc
        dims = ("parallel", "parallel", "parallel", "arbitrary")
    else:
        kern = _make_attn_kernel_head_loop(heads, d_k, use_mask, use_approx,
                                           mxu_dtype)
        grid = (B, Sq // tq, Sk // tkv)
        in_specs = [
            pl.BlockSpec((1, tq, d_model), lambda b, qi, ki: (b, qi, 0)),
            pl.BlockSpec((1, tkv, d_model), lambda b, qi, ki: (b, ki, 0)),
            pl.BlockSpec((1, tkv, d_model), lambda b, qi, ki: (b, ki, 0)),
        ]
        if use_mask:
            if mask_is_key:
                in_specs.append(
                    pl.BlockSpec((1, 1, tkv), lambda b, qi, ki: (b, 0, ki)))
            else:
                in_specs.append(
                    pl.BlockSpec((1, tq, tkv), lambda b, qi, ki: (b, qi, ki)))
        out_spec = pl.BlockSpec((1, tq, d_model), lambda b, qi, ki: (b, qi, 0))
        scratch = [pltpu.VMEM((heads, tq, 1), jnp.float32),    # running max m
                   pltpu.VMEM((heads, tq, 1), jnp.float32),    # running sum l
                   pltpu.VMEM((heads, tq, d_k), jnp.float32)]  # running acc
        dims = ("parallel", "parallel", "arbitrary")

    args = [qp, kp, vp] + ([mask_arr] if use_mask else [])

    return pl.pallas_call(
        kern,
        out_shape=jax.ShapeDtypeStruct((B, Sq, d_model), qp.dtype),
        grid=grid,
        in_specs=in_specs,
        out_specs=out_spec,
        scratch_shapes=scratch,
        compiler_params=pltpu.CompilerParams(
            dimension_semantics=dims,
            vmem_limit_bytes=vmem_limit,
        ),
        cost_estimate=cost,
    )(*args)


# ------------------------------- Forward pass ------------------------------ #

def prepare_params(raw, heads, compute_dtype=jnp.float32):
    """One-time weight prep: fold 1/sqrt(d_k) into Q, pre-transpose, fuse QKV."""
    cdt = compute_dtype
    d_model = raw["w_q"].shape[0]
    d_k = d_model // heads
    scale = 1.0 / math.sqrt(d_k)
    w_q = raw["w_q"] * scale            # softmax scale folded into Q projection
    b_q = raw["b_q"] * scale
    w_qkv_t = jnp.concatenate([w_q, raw["w_k"], raw["w_v"]], axis=0).T.astype(cdt)
    b_qkv = jnp.concatenate([b_q, raw["b_k"], raw["b_v"]]).astype(jnp.float32)
    return {
        "dtype": cdt, "heads": heads,
        "w_qkv_t": w_qkv_t, "b_qkv": b_qkv,
        "w_q_t": w_q.T.astype(cdt), "b_q": b_q.astype(jnp.float32),
        "w_k_t": raw["w_k"].T.astype(cdt), "b_k": raw["b_k"].astype(jnp.float32),
        "w_v_t": raw["w_v"].T.astype(cdt), "b_v": raw["b_v"].astype(jnp.float32),
        "w_o_t": raw["w_o"].T.astype(cdt), "b_o": raw["b_o"].astype(jnp.float32),
    }


def multi_head_attention_forward(q, k, v, params, heads, mask=None,
                                 fuse_qkv=None, attn_mxu_dtype=None):
    B, Sq, d_model = q.shape
    Sk = k.shape[1]
    out_dtype = q.dtype
    cdt = params["dtype"]
    if fuse_qkv is None:
        # Object identity only; equal-but-distinct jit tracers fall back to the
        # (always correct) separate-projection path.
        fuse_qkv = (q is k) and (k is v)
    if fuse_qkv:
        assert k.shape == q.shape and v.shape == q.shape, \
            "fuse_qkv=True requires identically-shaped q/k/v (self-attention)"

    if fuse_qkv:
        qkv = linear(q.reshape(B * Sq, d_model), params["w_qkv_t"],
                     params["b_qkv"], cdt)                       # (B*Sq, 3*dm)
        qp = qkv[:, 0 * d_model:1 * d_model].reshape(B, Sq, d_model)
        kp = qkv[:, 1 * d_model:2 * d_model].reshape(B, Sq, d_model)
        vp = qkv[:, 2 * d_model:3 * d_model].reshape(B, Sq, d_model)
    else:
        qp = linear(q.reshape(B * Sq, d_model), params["w_q_t"],
                    params["b_q"], cdt).reshape(B, Sq, d_model)
        kp = linear(k.reshape(B * Sk, d_model), params["w_k_t"],
                    params["b_k"], cdt).reshape(B, Sk, d_model)
        vp = linear(v.reshape(B * Sk, d_model), params["w_v_t"],
                    params["b_v"], cdt).reshape(B, Sk, d_model)

    # (B, Sq, d_model) in, (B, Sq, d_model) out: no head transposes anywhere.
    attn = attention_heads(qp, kp, vp, heads, mask=mask, mxu_dtype=attn_mxu_dtype)
    out = linear(attn.reshape(B * Sq, d_model), params["w_o_t"],
                 params["b_o"], out_dtype)
    return out.reshape(B, Sq, d_model)


# -------------------------- Pure-JAX reference ------------------------------ #

def reference_forward(q, k, v, raw, heads, mask=None):
    B, Sq, d_model = q.shape
    d_k = d_model // heads

    def lin(x, w, b):
        return x @ w.T + b

    def split(x):
        return x.reshape(B, -1, heads, d_k).transpose(0, 2, 1, 3)

    qh = split(lin(q, raw["w_q"], raw["b_q"]))
    kh = split(lin(k, raw["w_k"], raw["b_k"]))
    vh = split(lin(v, raw["w_v"], raw["b_v"]))
    scores = (qh @ kh.transpose(0, 1, 3, 2)) / math.sqrt(d_k)
    if mask is not None:
        scores = jnp.where(mask[:, None] == 0, _NEG_INF_BIAS, scores)
    p = jax.nn.softmax(scores, axis=-1)
    out = p @ vh
    concat = out.transpose(0, 2, 1, 3).reshape(B, Sq, d_model)
    return lin(concat, raw["w_o"], raw["b_o"])


# ---------------------------------- Main ----------------------------------- #

def init_params(key, d_model):
    """Deterministic init mimicking nn.Linear (uniform in +-1/sqrt(fan_in))."""
    bound = 1.0 / math.sqrt(d_model)
    keys = jax.random.split(key, 8)
    u = lambda kk, shape: jax.random.uniform(kk, shape, jnp.float32, -bound, bound)
    return {
        "w_q": u(keys[0], (d_model, d_model)), "b_q": u(keys[1], (d_model,)),
        "w_k": u(keys[2], (d_model, d_model)), "b_k": u(keys[3], (d_model,)),
        "w_v": u(keys[4], (d_model, d_model)), "b_v": u(keys[5], (d_model,)),
        "w_o": u(keys[6], (d_model, d_model)), "b_o": u(keys[7], (d_model,)),
    }


if __name__ == "__main__":
    root = jax.random.PRNGKey(0)
    keys = jax.random.split(root, 8)

    # ----- config 1: d_model=32, heads=4 (d_k=8 -> in-kernel head loop) ----- #
    B, S, d_model, heads = 2, 8, 32, 4
    q = jax.random.normal(keys[0], (B, S, d_model), jnp.float32)
    k = jax.random.normal(keys[1], (B, S, d_model), jnp.float32)
    v = jax.random.normal(keys[2], (B, S, d_model), jnp.float32)
    raw = init_params(keys[3], d_model)
    params_f32 = prepare_params(raw, heads, jnp.float32)
    params_bf16 = prepare_params(raw, heads, jnp.bfloat16)

    # 1) Cross-attention, f32, no mask -> separate projections, tight check.
    out1 = jax.block_until_ready(
        multi_head_attention_forward(q, k, v, params_f32, heads, mask=None,
                                     fuse_qkv=False))
    ref1 = reference_forward(q, k, v, raw, heads, mask=None)
    assert out1.shape == (B, S, d_model)
    assert jnp.allclose(out1, ref1, rtol=1e-4, atol=1e-4), "mismatch (cross, f32)"

    # 2) Self-attention, f32, full (B, Sq, Sk) mask -> fused QKV, int8 mask.
    mask_full = (jax.random.uniform(keys[4], (B, S, S)) > 0.3).astype(jnp.int32)
    mask_full = mask_full.at[:, :, 0].set(1)       # >=1 valid key per query row
    out2 = jax.block_until_ready(
        multi_head_attention_forward(q, q, q, params_f32, heads, mask=mask_full,
                                     fuse_qkv=True))
    ref2 = reference_forward(q, q, q, raw, heads, mask=mask_full)
    assert jnp.allclose(out2, ref2, rtol=1e-4, atol=1e-4), "mismatch (masked, f32)"

    # 3) Self-attention, end-to-end bf16 compute (f32 accumulation / softmax).
    out3 = jax.block_until_ready(
        multi_head_attention_forward(q, q, q, params_bf16, heads, mask=None,
                                     fuse_qkv=True))
    ref3 = reference_forward(q, q, q, raw, heads, mask=None)
    assert jnp.allclose(out3, ref3, rtol=1e-1, atol=1e-1), "mismatch (bf16)"

    # 4) f32 activations with bf16 MXU operands inside attention (v6e/v7x path).
    out4 = jax.block_until_ready(
        multi_head_attention_forward(q, q, q, params_f32, heads, mask=None,
                                     fuse_qkv=True, attn_mxu_dtype=jnp.bfloat16))
    ref4 = reference_forward(q, q, q, raw, heads, mask=None)
    assert jnp.allclose(out4, ref4, rtol=1e-1, atol=1e-1), "mismatch (bf16 MXU)"

    # ----- config 2: d_model=256, heads=2 (d_k=128 -> heads on the grid) ---- #
    B2, S2, d_model2, heads2 = 2, 16, 256, 2
    q2 = jax.random.normal(keys[5], (B2, S2, d_model2), jnp.float32)
    raw2 = init_params(keys[6], d_model2)
    params2 = prepare_params(raw2, heads2, jnp.float32)
    # Key-padding mask (B, 1, Sk): DMA'd un-broadcast (no Sq replication).
    key_mask = (jax.random.uniform(keys[7], (B2, 1, S2)) > 0.3).astype(jnp.int32)
    key_mask = key_mask.at[:, :, 0].set(1)         # >=1 valid key per batch
    out5 = jax.block_until_ready(
        multi_head_attention_forward(q2, q2, q2, params2, heads2, mask=key_mask,
                                     fuse_qkv=True))
    ref5 = reference_forward(q2, q2, q2, raw2, heads2, mask=key_mask)
    assert out5.shape == (B2, S2, d_model2)
    assert jnp.allclose(out5, ref5, rtol=2e-3, atol=2e-3), "mismatch (head-grid)"

    print("KERNEL_OK")
</pallas_src>

<mosaic_0001>
module attributes {stable_mosaic.version = 11 : i64} {
  func.func @_matmul_bias_kernel(%arg0: i32, %arg1: i32, %arg2: i32, %arg3: memref<16x32xf32, #tpu.memory_space<vmem>>, %arg4: memref<32x32xf32, #tpu.memory_space<vmem>>, %arg5: memref<1x32xf32, #tpu.memory_space<vmem>>, %arg6: memref<16x32xf32, #tpu.memory_space<vmem>>, %arg7: memref<16x32xf32, #tpu.memory_space<vmem>>) attributes {dimension_semantics = [#tpu.dimension_semantics<parallel>, #tpu.dimension_semantics<parallel>, #tpu.dimension_semantics<arbitrary>], iteration_bounds = array<i64: 1, 1, 1>, scalar_prefetch = 0 : i64, scratch_operands = 1 : i64, tpu.core_type = #tpu.core_type<tc>, window_params = [{transform_indices = @transform_0, window_bounds = array<i64: 16, 32>}, {transform_indices = @transform_1, window_bounds = array<i64: 32, 32>}, {transform_indices = @transform_2, window_bounds = array<i64: 1, 32>}, {transform_indices = @transform_3, window_bounds = array<i64: 16, 32>}]} {
    %c0_i32 = arith.constant 0 : i32
    %0 = arith.cmpi eq, %arg2, %c0_i32 : i32
    %1 = arith.extui %0 : i1 to i32
    %c0_i32_0 = arith.constant 0 : i32
    %2 = arith.cmpi ne, %1, %c0_i32_0 : i32
    scf.if %2 {
      %cst_10 = arith.constant 0.000000e+00 : f32
      %12 = vector.broadcast %cst_10 : f32 to vector<16x32xf32>
      %c0_11 = arith.constant 0 : index
      %c0_12 = arith.constant 0 : index
      %13 = vector.load %arg7[%c0_11, %c0_12] : memref<16x32xf32, #tpu.memory_space<vmem>>, vector<16x32xf32>
      tpu.vector_store %arg7[%c0_11, %c0_12], %12 {strides = array<i32>} : memref<16x32xf32, #tpu.memory_space<vmem>>, vector<16x32xf32>,
    } else {
    }
    %c0 = arith.constant 0 : index
    %c0_1 = arith.constant 0 : index
    %3 = vector.load %arg7[%c0, %c0_1] : memref<16x32xf32, #tpu.memory_space<vmem>>, vector<16x32xf32>
    %c0_2 = arith.constant 0 : index
    %c0_3 = arith.constant 0 : index
    %4 = vector.load %arg3[%c0_2, %c0_3] : memref<16x32xf32, #tpu.memory_space<vmem>>, vector<16x32xf32>
    %c0_4 = arith.constant 0 : index
    %c0_5 = arith.constant 0 : index
    %5 = vector.load %arg4[%c0_4, %c0_5] : memref<32x32xf32, #tpu.memory_space<vmem>>, vector<32x32xf32>
    %cst = arith.constant dense<0.000000e+00> : vector<16x32xf32>
    %6 = tpu.matmul %4, %5, %cst {dimension_numbers = #tpu.dot_dimension_numbers<[1], [0], [0], [1], [0, 0, 1, 1], [], []>} : vector<16x32xf32>, vector<32x32xf32>, vector<16x32xf32> -> vector<16x32xf32>
    %7 = arith.addf %3, %6 : vector<16x32xf32>
    %c0_6 = arith.constant 0 : index
    %c0_7 = arith.constant 0 : index
    %8 = vector.load %arg7[%c0_6, %c0_7] : memref<16x32xf32, #tpu.memory_space<vmem>>, vector<16x32xf32>
    tpu.vector_store %arg7[%c0_6, %c0_7], %7 {strides = array<i32>} : memref<16x32xf32, #tpu.memory_space<vmem>>, vector<16x32xf32>,
    %c0_i32_8 = arith.constant 0 : i32
    %9 = arith.cmpi eq, %arg2, %c0_i32_8 : i32
    %10 = arith.extui %9 : i1 to i32
    %c0_i32_9 = arith.constant 0 : i32
    %11 = arith.cmpi ne, %10, %c0_i32_9 : i32
    scf.if %11 {
      %c0_10 = arith.constant 0 : index
      %c0_11 = arith.constant 0 : index
      %12 = vector.load %arg7[%c0_10, %c0_11] : memref<16x32xf32, #tpu.memory_space<vmem>>, vector<16x32xf32>
      %c0_12 = arith.constant 0 : index
      %c0_13 = arith.constant 0 : index
      %13 = vector.load %arg5[%c0_12, %c0_13] : memref<1x32xf32, #tpu.memory_space<vmem>>, vector<1x32xf32>
      %14 = vector.broadcast %13 : vector<1x32xf32> to vector<16x32xf32>
      %15 = arith.addf %12, %14 : vector<16x32xf32>
      %c0_14 = arith.constant 0 : index
      %c0_15 = arith.constant 0 : index
      %16 = vector.load %arg6[%c0_14, %c0_15] : memref<16x32xf32, #tpu.memory_space<vmem>>, vector<16x32xf32>
      tpu.vector_store %arg6[%c0_14, %c0_15], %15 {strides = array<i32>} : memref<16x32xf32, #tpu.memory_space<vmem>>, vector<16x32xf32>,
    } else {
    }
    return
  }
  func.func @transform_0(%arg0: i32, %arg1: i32, %arg2: i32) -> (i32, i32) {
    %c0_i32 = arith.constant 0 : i32
    return %arg0, %arg2 : i32, i32
  }
  func.func @transform_1(%arg0: i32, %arg1: i32, %arg2: i32) -> (i32, i32) {
    %c0_i32 = arith.constant 0 : i32
    return %arg2, %arg1 : i32, i32
  }
  func.func @transform_2(%arg0: i32, %arg1: i32, %arg2: i32) -> (i32, i32) {
    %c0_i32 = arith.constant 0 : i32
    %c0_i32_0 = arith.constant 0 : i32
    return %c0_i32, %arg1 : i32, i32
  }
  func.func @transform_3(%arg0: i32, %arg1: i32, %arg2: i32) -> (i32, i32) {
    %c0_i32 = arith.constant 0 : i32
    return %arg0, %arg1 : i32, i32
  }
}

</mosaic_0001>

<bundles_post_ra>
// kernel: tpu_custom_call.1
= control target key start
LH: loop header
LB: loop body
LE: loop exit
PB: predicated region body
PF: predicated region fallthrough
CT: control target
= control target key end

     0   :  { %8 = vsyncpa [#allocation4], 0  ;;  %s275_s0 = inlined_call_operand.hbm [shape: f32[16,32], index: 0, kind: input, shape index: {}]   ;;  %s276_s1 = inlined_call_operand.hbm [shape: f32[32,32], index: 1, kind: input, shape index: {}]   ;;  %s277_s2 = inlined_call_operand.vmem [shape: f32[1,32], index: 2, kind: input, shape index: {}]   ;;  %s278_s3 = inlined_call_operand.hbm [shape: f32[16,32], index: 3, kind: output, shape index: {}]  }
   0x1   :  { %9 = vsyncpa [#allocation7], 0 }
   0x2   :  { %10 = vsyncpa [#allocation5], 0  ;;  %s15_s14 = sshll.u32 %s275_s0, 4  ;;  %s220_s15 = smov [#allocation3]   ;;  %s16_s14 = int_to_ptr.hbm [resolvable:$true] %s15_s14 }
   0x3   :  { %s17_s16 = sshll.u32 %s220_s15, 4  ;;  %s28_s19 = sshll.u32 %s276_s1, 4  ;;  %s18_s16 = int_to_ptr.vmem [resolvable:$true] %s17_s16  ;;  %s29_s19 = int_to_ptr.hbm [resolvable:$true] %s28_s19 }
   0x4   :  { %s221_s20 = smov 128   ;;  %s222_s21 = smov 8  }
   0x5   :  { %23 = dma.hbm_to_vmem [thread:$0]  %s16_s14, 256, %s18_s16, [#allocation4], %s221_s20, %s221_s20, %s222_s21  }
   0x6   :  { %s223_s22 = smov [#allocation6]  }
   0x7   :  { %s30_s23 = sshll.u32 %s223_s22, 4  ;;  %s31_s23 = int_to_ptr.vmem [resolvable:$true] %s30_s23 }
   0x8   :  { %36 = dma.hbm_to_vmem [thread:$0]  %s29_s19, 512, %s31_s23, [#allocation7], %s221_s20, %s221_s20, %s222_s21  }
   0x9   :  { %214 = dma.done.wait [#allocation4], 256  }
   0xa   :  { %215 = vsyncadd [#allocation4], 4294967040 }
   0xb   :  { %216 = dma.done.wait [#allocation7], 512  }
   0xc   :  { %217 = vsyncadd [#allocation7], 4294966784  ;;  %vm51_vm0 = vcmask 261120   ;;  %v224_v0 = vmov 0.0   ;;  %v61_v1 = vld [vmem:[#allocation6 + $0x18] sm:$0xff]  ;;  %v60_v2 = vld [vmem:[#allocation6 + $0x10] sm:$0xff] }
   0xd   :  { %52 = vst.msk [vmem:[#allocation2] sm:$0xff] %vm51_vm0, %v224_v0  ;;  %81 = vmatpush.msra.mxu0 %v61_v1  ;;  %131 = vmatpush.msra.mxu1 %v61_v1  ;;  %v59_v3 = vld [vmem:[#allocation6 + $0x8] sm:$0xff]  ;;  %v58_v4 = vld [vmem:[#allocation6] sm:$0xff]  ;;  %v56_v5 = vld [vmem:[#allocation3] sm:$0xff]  ;;  %s225_s24 = smov [#allocation8]   ;;  %s115_s28 = sshll.u32 %s278_s3, 4  ;;  %s116_s28 = int_to_ptr.hbm [resolvable:$true] %s115_s28 }
   0xe   :  { %53 = vst.msk [vmem:[#allocation2 + $0x8] sm:$0xff] %vm51_vm0, %v224_v0  ;;  %v57_v6 = vld [vmem:[#allocation3 + $0x8] sm:$0xff]  ;;  %v141_v13 = vld [vmem:[%s277_s2] ss:$0 sm:$0xff]  ;;  %s113_s25 = sshll.u32 %s225_s24, 4  ;;  %s114_s25 = int_to_ptr.vmem [resolvable:$true] %s113_s25 }
   0xf   :  { %82 = vmatpush.msra.mxu0 %v60_v2  ;;  %132 = vmatpush.msra.mxu1 %v60_v2 }
  0x11   :  { %83 = vmatpush.msra.mxu0 %v59_v3  ;;  %133 = vmatpush.msra.mxu1 %v59_v3 }
  0x13   :  { %84 = vmatpush.msra.mxu0 %v58_v4  ;;  %134 = vmatpush.msra.mxu1 %v58_v4 }
  0x14   :  { %129 = vmatmul.msk.f32.vlgmr.msra.gmra.mxu0 %vm51_vm0, %v56_v5  ;;  %130 = vmatmul.msk.f32.vlgmr.msra.gmra.mxu1 %vm51_vm0, %v57_v6  ;;  %v54_v7 = vld [vmem:[#allocation2] sm:$0xff] }
  0x15   :  { %v55_v8 = vld [vmem:[#allocation2 + $0x8] sm:$0xff] }
  0x91   :  { %v86_v9 = vpop.f32.mrf.mxu0  ;;  %v89_v10 = vpop.f32.mrf.mxu1 }
  0x92   :  { %v92_v11 = vadd.f32 %v86_v9, %v54_v7  ;;  %v93_v12 = vadd.f32 %v89_v10, %v55_v8 }
  0x94   :  { %94 = vst.msk [vmem:[#allocation2] sm:$0xff] %vm51_vm0, %v92_v11 }
  0x95   :  { %95 = vst.msk [vmem:[#allocation2 + $0x8] sm:$0xff] %vm51_vm0, %v93_v12 }
  0x9b   :  { %v99_v14 = vld [vmem:[#allocation2] sm:$0xff] }
  0x9c   :  { %v100_v15 = vld [vmem:[#allocation2 + $0x8] sm:$0xff]  ;;  %v105_v16 = vadd.f32 %v141_v13, %v99_v14 }
  0x9d   :  { %v106_v17 = vadd.f32 %v141_v13, %v100_v15 }
  0x9e   :  { %107 = vst.msk [vmem:[#allocation8] sm:$0xff] %vm51_vm0, %v105_v16 }
  0x9f   :  { %108 = vst.msk [vmem:[#allocation8 + $0x8] sm:$0xff] %vm51_vm0, %v106_v17 }
  0xa0   :  { %121 = dma.vmem_to_hbm [thread:$0]  %s114_s25, 256, %s116_s28, [#allocation5], %s221_s20, %s221_s20, %s222_s21  }
  0xa1   :  { %218 = dma.done.wait [#allocation5], 256  }
  0xa2   :  { %219 = vsyncadd [#allocation5], 4294967040 }
  0xa3   :  { %126 = vsyncpa [#allocation4], 1 }
  0xa4   :  { %127 = vsyncpa [#allocation7], 1 }
  0xa5   :  { %128 = vsyncpa [#allocation5], 1 }

</bundles_post_ra>
